<compile_context>
chip_gen: v6e
topology: v6e:2x2x1
jax: 0.10.0
libtpu: 0.0.40
codegen_flags: <defaults>
</compile_context>

<pallas_src>
from functools import partial

import jax
import jax.numpy as jnp
from jax.experimental import pallas as pl
from jax.experimental.pallas import tpu as pltpu


# ----------------------------------------------------------------------------
# Kernel: fused per-row cosine  cos = <p,z> * rsqrt(|p|^2) * rsqrt(|z|^2),
# streamed over batch tiles, accumulated into a resident partial-sum block.
# ----------------------------------------------------------------------------
def d_loss_kernel(p_ref, z_ref, o_ref, *, tb, nb_per_core, batch_size, eps):
    c = pl.program_id(0)          # "parallel" core-split axis (v7x megacore)
    j = pl.program_id(1)          # "arbitrary" reduction axis (batch tiles)

    @pl.when(j == 0)
    def _():
        o_ref[...] = jnp.zeros_like(o_ref)

    p = p_ref[...].astype(jnp.float32)
    z = z_ref[...].astype(jnp.float32)          # .detach() is autograd-only -> identity

    pp = jnp.sum(p * p, axis=1, keepdims=True)  # (tb, 1)
    zz = jnp.sum(z * z, axis=1, keepdims=True)  # (tb, 1)
    pz = jnp.sum(p * z, axis=1, keepdims=True)  # (tb, 1)

    # F.normalize clamp: max(||x||, eps) == sqrt(max(||x||^2, eps^2)) for ||x||^2 >= 0
    eps2 = eps * eps
    cos = pz * jax.lax.rsqrt(jnp.maximum(pp, eps2)) * jax.lax.rsqrt(jnp.maximum(zz, eps2))

    if batch_size % tb != 0:
        # Tail tile: rows past the end of the batch read undefined data -> zero them
        # (jnp.where is a select, so NaN/Inf garbage cannot leak through).
        t = c * nb_per_core + j
        rows = t * tb + jax.lax.broadcasted_iota(jnp.int32, (tb, 1), 0)
        cos = jnp.where(rows < batch_size, cos, 0.0)

    # Broadcast the tile's scalar cosine-sum into this core's resident partial block.
    o_ref[...] += jnp.sum(cos)


def d_forward(p, z, *, tb_max=512):
    """Negative cosine similarity: -(normalize(p,1) * normalize(z,1)).sum(1).mean()."""
    B, C = p.shape
    assert z.shape == (B, C)

    # 512-row tiles (≈85% of HBM roofline); small batches use one full-array tile.
    tb = tb_max if B >= tb_max else B
    nb_total = pl.cdiv(B, tb)

    # Split batch tiles across 2 TensorCores when the tile count divides evenly
    # (v7x megacore; on 1-TC chips the "parallel" axis just runs serially).
    ncore = 2 if (nb_total >= 2 and nb_total % 2 == 0) else 1
    nb_per_core = nb_total // ncore

    kern = partial(d_loss_kernel, tb=tb, nb_per_core=nb_per_core,
                   batch_size=B, eps=1e-12)

    cost = pl.CostEstimate(
        flops=6 * B * C,                          # 3 muls + 3 add-reductions per element
        transcendentals=2 * B,                    # 2 rsqrt per row
        bytes_accessed=(B * C * jnp.dtype(p.dtype).itemsize
                        + B * C * jnp.dtype(z.dtype).itemsize
                        + ncore * 8 * 128 * 4),
    )

    partials = pl.pallas_call(
        kern,
        out_shape=jax.ShapeDtypeStruct((ncore, 8, 128), jnp.float32),
        grid_spec=pltpu.PrefetchScalarGridSpec(
            num_scalar_prefetch=0,
            grid=(ncore, nb_per_core),
            in_specs=[
                pl.BlockSpec((tb, C), lambda c, j: (c * nb_per_core + j, 0)),
                pl.BlockSpec((tb, C), lambda c, j: (c * nb_per_core + j, 0)),
            ],
            # One resident (8,128) partial-sum block per core; accumulated across j.
            out_specs=pl.BlockSpec((1, 8, 128), lambda c, j: (c, 0, 0)),
        ),
        compiler_params=pltpu.CompilerParams(
            dimension_semantics=("parallel", "arbitrary"),
            vmem_limit_bytes=48 << 20,
        ),
        cost_estimate=cost,
    )(p, z)

    # Tiny epilogue in the wrapper: combine per-core partials, negate, mean.
    return -(jnp.sum(partials[:, 0, 0]) / B)


# ----------------------------------------------------------------------------
# Pure-JAX reference (correctness check)
# ----------------------------------------------------------------------------
def d_reference(p, z):
    pn = p / jnp.maximum(jnp.linalg.norm(p, axis=1, keepdims=True), 1e-12)
    zn = z / jnp.maximum(jnp.linalg.norm(z, axis=1, keepdims=True), 1e-12)
    return -jnp.mean(jnp.sum(pn * zn, axis=1))


if __name__ == "__main__":
    key = jax.random.PRNGKey(0)
    kp, kz, kp2, kz2 = jax.random.split(key, 4)

    # Small shapes consistent with the module (SimSiam feeds [B, 2048]; use a
    # small batch and a 128-multiple feature dim here).
    B, C = 4, 256
    p = jax.random.normal(kp, (B, C), jnp.float32)
    z = jax.random.normal(kz, (B, C), jnp.float32)

    loss = jax.block_until_ready(jax.jit(d_forward)(p, z))
    ref = d_reference(p, z)
    assert loss.shape == (), loss.shape
    assert jnp.isfinite(loss)
    assert jnp.allclose(loss, ref, atol=1e-5, rtol=1e-4), (loss, ref)

    # Also exercise the tiled + masked-tail + per-core-partial path (B > 512,
    # not a multiple of the 512-row tile).
    B2, C2 = 520, 256
    p2 = jax.random.normal(kp2, (B2, C2), jnp.float32)
    z2 = jax.random.normal(kz2, (B2, C2), jnp.float32)
    loss2 = jax.block_until_ready(jax.jit(d_forward)(p2, z2))
    ref2 = d_reference(p2, z2)
    assert jnp.allclose(loss2, ref2, atol=1e-5, rtol=1e-4), (loss2, ref2)

    print("KERNEL_OK")
</pallas_src>

<mosaic_0001>
module attributes {stable_mosaic.version = 11 : i64} {
  func.func @d_loss_kernel(%arg0: i32, %arg1: i32, %arg2: memref<4x256xf32, #tpu.memory_space<vmem>>, %arg3: memref<4x256xf32, #tpu.memory_space<vmem>>, %arg4: memref<1x8x128xf32, #tpu.memory_space<vmem>>) attributes {dimension_semantics = [#tpu.dimension_semantics<parallel>, #tpu.dimension_semantics<arbitrary>], iteration_bounds = array<i64: 1, 1>, scalar_prefetch = 0 : i64, scratch_operands = 0 : i64, tpu.core_type = #tpu.core_type<tc>, window_params = [{transform_indices = @transform_0, window_bounds = array<i64: 4, 256>}, {transform_indices = @transform_1, window_bounds = array<i64: 4, 256>}, {transform_indices = @transform_2, window_bounds = array<i64: 1, 8, 128>}]} {
    %c0_i32 = arith.constant 0 : i32
    %0 = arith.cmpi eq, %arg1, %c0_i32 : i32
    %1 = arith.extui %0 : i1 to i32
    %c0_i32_0 = arith.constant 0 : i32
    %2 = arith.cmpi ne, %1, %c0_i32_0 : i32
    scf.if %2 {
      %cst_15 = arith.constant 0.000000e+00 : f32
      %30 = vector.broadcast %cst_15 : f32 to vector<1x8x128xf32>
      %c0_16 = arith.constant 0 : index
      %c0_17 = arith.constant 0 : index
      %c0_18 = arith.constant 0 : index
      %31 = vector.load %arg4[%c0_16, %c0_17, %c0_18] : memref<1x8x128xf32, #tpu.memory_space<vmem>>, vector<1x8x128xf32>
      tpu.vector_store %arg4[%c0_16, %c0_17, %c0_18], %30 {strides = array<i32>} : memref<1x8x128xf32, #tpu.memory_space<vmem>>, vector<1x8x128xf32>,
    } else {
    }
    %c0 = arith.constant 0 : index
    %c0_1 = arith.constant 0 : index
    %3 = vector.load %arg2[%c0, %c0_1] : memref<4x256xf32, #tpu.memory_space<vmem>>, vector<4x256xf32>
    %c0_2 = arith.constant 0 : index
    %c0_3 = arith.constant 0 : index
    %4 = vector.load %arg3[%c0_2, %c0_3] : memref<4x256xf32, #tpu.memory_space<vmem>>, vector<4x256xf32>
    %5 = arith.mulf %3, %3 : vector<4x256xf32>
    %cst = arith.constant dense<0.000000e+00> : vector<4xf32>
    %6 = vector.multi_reduction <add>, %5, %cst [1] : vector<4x256xf32> to vector<4xf32>
    %7 = vector.shape_cast %6 : vector<4xf32> to vector<4x1xf32>
    %8 = arith.mulf %4, %4 : vector<4x256xf32>
    %cst_4 = arith.constant dense<0.000000e+00> : vector<4xf32>
    %9 = vector.multi_reduction <add>, %8, %cst_4 [1] : vector<4x256xf32> to vector<4xf32>
    %10 = vector.shape_cast %9 : vector<4xf32> to vector<4x1xf32>
    %11 = arith.mulf %3, %4 : vector<4x256xf32>
    %cst_5 = arith.constant dense<0.000000e+00> : vector<4xf32>
    %12 = vector.multi_reduction <add>, %11, %cst_5 [1] : vector<4x256xf32> to vector<4xf32>
    %13 = vector.shape_cast %12 : vector<4xf32> to vector<4x1xf32>
    %cst_6 = arith.constant 1.000000e-24 : f32
    %14 = vector.broadcast %cst_6 : f32 to vector<4x1xf32>
    %15 = arith.maximumf %7, %14 : vector<4x1xf32>
    %16 = math.rsqrt %15 : vector<4x1xf32>
    %17 = arith.mulf %13, %16 : vector<4x1xf32>
    %cst_7 = arith.constant 1.000000e-24 : f32
    %18 = vector.broadcast %cst_7 : f32 to vector<4x1xf32>
    %19 = arith.maximumf %10, %18 : vector<4x1xf32>
    %20 = math.rsqrt %19 : vector<4x1xf32>
    %21 = arith.mulf %17, %20 : vector<4x1xf32>
    %c0_8 = arith.constant 0 : index
    %c0_9 = arith.constant 0 : index
    %c0_10 = arith.constant 0 : index
    %22 = vector.load %arg4[%c0_8, %c0_9, %c0_10] : memref<1x8x128xf32, #tpu.memory_space<vmem>>, vector<1x8x128xf32>
    %23 = vector.shape_cast %21 : vector<4x1xf32> to vector<1x4x1xf32>
    %cst_11 = arith.constant dense<0.000000e+00> : vector<1xf32>
    %24 = vector.multi_reduction <add>, %23, %cst_11 [1, 2] : vector<1x4x1xf32> to vector<1xf32>
    %25 = vector.shape_cast %24 : vector<1xf32> to vector<1x1x1xf32>
    %26 = vector.extract %25[0, 0, 0] : f32 from vector<1x1x1xf32>
    %27 = vector.broadcast %26 : f32 to vector<1x8x128xf32>
    %28 = arith.addf %22, %27 : vector<1x8x128xf32>
    %c0_12 = arith.constant 0 : index
    %c0_13 = arith.constant 0 : index
    %c0_14 = arith.constant 0 : index
    %29 = vector.load %arg4[%c0_12, %c0_13, %c0_14] : memref<1x8x128xf32, #tpu.memory_space<vmem>>, vector<1x8x128xf32>
    tpu.vector_store %arg4[%c0_12, %c0_13, %c0_14], %28 {strides = array<i32>} : memref<1x8x128xf32, #tpu.memory_space<vmem>>, vector<1x8x128xf32>,
    return
  }
  func.func @transform_0(%arg0: i32, %arg1: i32) -> (i32, i32) {
    %c1_i32 = arith.constant 1 : i32
    %0 = arith.muli %arg0, %c1_i32 : i32
    %1 = arith.addi %0, %arg1 : i32
    %c0_i32 = arith.constant 0 : i32
    %c0_i32_0 = arith.constant 0 : i32
    return %1, %c0_i32 : i32, i32
  }
  func.func @transform_1(%arg0: i32, %arg1: i32) -> (i32, i32) {
    %c1_i32 = arith.constant 1 : i32
    %0 = arith.muli %arg0, %c1_i32 : i32
    %1 = arith.addi %0, %arg1 : i32
    %c0_i32 = arith.constant 0 : i32
    %c0_i32_0 = arith.constant 0 : i32
    return %1, %c0_i32 : i32, i32
  }
  func.func @transform_2(%arg0: i32, %arg1: i32) -> (i32, i32, i32) {
    %c0_i32 = arith.constant 0 : i32
    %c0_i32_0 = arith.constant 0 : i32
    %c0_i32_1 = arith.constant 0 : i32
    return %arg0, %c0_i32, %c0_i32_0 : i32, i32, i32
  }
}

</mosaic_0001>

<bundles_post_ra>
// kernel: d_forward.1
= control target key start
LH: loop header
LB: loop body
LE: loop exit
PB: predicated region body
PF: predicated region fallthrough
CT: control target
= control target key end

     0   :  { %7 = vsyncpa [#allocation3], 0  ;;  %s186_s0 = inlined_call_operand.hbm [shape: f32[4,256], index: 0, kind: input, shape index: {}]   ;;  %s187_s1 = inlined_call_operand.hbm [shape: f32[4,256], index: 1, kind: input, shape index: {}]   ;;  %s188_s2 = inlined_call_operand.vmem [shape: f32[1,8,128], index: 2, kind: output, shape index: {}]  }
   0x1   :  { %8 = vsyncpa [#allocation5], 0  ;;  %s160_s9 = smov [#allocation2]   ;;  %s161_s11 = smov [#allocation4]  }
   0x2   :  { %s19_s10 = sshll.u32 %s160_s9, 4  ;;  %s33_s12 = sshll.u32 %s161_s11, 4  ;;  %s20_s10 = int_to_ptr.vmem [resolvable:$true] %s19_s10  ;;  %s34_s12 = int_to_ptr.vmem [resolvable:$true] %s33_s12 }
   0x3   :  { %s124_s13 = scalar_lea.vmem %s20_s10, 128  ;;  %p129_p1 = scmp.lt.s32.totalorder %s20_s10, %s20_s10 }
   0x4   :  { %p125_p0 = scmp.ne.s32.totalorder %s20_s10, %s124_s13  ;;  %p130_p2 = scmp.lt.s32.totalorder %s124_s13, %s124_s13 }
   0x6   :  { %p131_p3 = por %p130_p2, %p129_p1 }
   0x8   :  { %p132_p4 = pnand %p131_p3, %p125_p0 }
   0xa   :  { %135 = shalt.err (!%p132_p4)
}
   0xb   :  { %22 = dma.hbm_to_vmem [thread:$0]  %s186_s0, 128, %s20_s10, [#allocation3]  }
   0xc   :  { %s144_s16 = scalar_lea.vmem %s34_s12, 128  ;;  %p149_p6 = scmp.lt.s32.totalorder %s34_s12, %s34_s12 }
   0xd   :  { %p145_p5 = scmp.ne.s32.totalorder %s34_s12, %s144_s16  ;;  %p150_p7 = scmp.lt.s32.totalorder %s144_s16, %s144_s16 }
   0xf   :  { %p151_p8 = por %p150_p7, %p149_p6 }
  0x11   :  { %p152_p9 = pnand %p151_p8, %p145_p5 }
  0x13   :  { %155 = shalt.err (!%p152_p9)
}
  0x14   :  { %36 = dma.hbm_to_vmem [thread:$0]  %s187_s1, 128, %s34_s12, [#allocation5]  }
  0x15   :  { %156 = dma.done.wait [#allocation3], 128  }
  0x16   :  { %157 = vsyncadd [#allocation3], 4294967168 }
  0x17   :  { %158 = dma.done.wait [#allocation5], 128  }
  0x18   :  { %159 = vsyncadd [#allocation5], 4294967168  ;;  %v50_v0 = vld [vmem:[#allocation2] sm:$0xff]  ;;  %vm56_vm0 = vcmask 1043456   ;;  %v51_v1 = vld [vmem:[#allocation4] sm:$0xff]  ;;  %vm87_vm1 = vcmask 3072  }
  0x19   :  { %v52_v2 = vmul.f32 %v50_v0, %v50_v0  ;;  %v62_v3 = vmul.f32 %v51_v1, %v51_v1  ;;  %v71_v4 = vmul.f32 %v51_v1, %v50_v0 }
  0x1b   :  { %v54_v5 = vcombine.high %v52_v2, %v52_v2  ;;  %v57_v6 = vsel %vm56_vm0, %v52_v2, 0.0  ;;  %v64_v7 = vcombine.high %v62_v3, %v62_v3  ;;  %v73_v8 = vcombine.high %v71_v4, %v71_v4 }
  0x1c   :  { %v75_v9 = vsel %vm56_vm0, %v71_v4, 0.0  ;;  %v66_v11 = vsel %vm56_vm0, %v62_v3, 0.0 }
  0x1d   :  { %v58_v10 = vsel %vm56_vm0, %v54_v5, 0.0  ;;  %v67_v12 = vsel %vm56_vm0, %v64_v7, 0.0  ;;  %v76_v14 = vsel %vm56_vm0, %v73_v8, 0.0 }
  0x1e   :  { %v59_v13 = vadd.f32 %v58_v10, %v57_v6  ;;  %v77_v15 = vadd.f32 %v76_v14, %v75_v9  ;;  %v68_v16 = vadd.f32 %v67_v12, %v66_v11 }
  0x20   :  { %60 = vadd.xlane.f32.xlu0 %v59_v13  ;;  %78 = vadd.xlane.f32.xlu1 %v77_v15 }
  0x24   :  { %69 = vadd.xlane.f32.xlu0 %v68_v16 }
  0xa9   :  { %v61_v17 = vpop.xlane.xlu0 %60  ;;  %v79_v22 = vpop.xlane.xlu1 %78 }
  0xaa   :  { %v80_v18 = vmax.f32 %v61_v17, 1e-24 }
  0xac   :  { %112 = vrsqrt.f32 %v80_v18 }
  0xad   :  { %v70_v19 = vpop.xlane.xlu0 %69 }
  0xae   :  { %v83_v20 = vmax.f32 %v70_v19, 1e-24 }
  0xb0   :  { %114 = vrsqrt.f32 %v83_v20 }
  0xb9   :  { %v113_v21 = vpop.eup %112 }
  0xba   :  { %v82_v23 = vmul.f32 %v113_v21, %v79_v22 }
  0xbd   :  { %v115_v24 = vpop.eup %114 }
  0xbe   :  { %v85_v25 = vmul.f32 %v115_v24, %v82_v23 }
  0xc0   :  { %v88_v26 = vsel %vm87_vm1, %v85_v25, 0.0 }
  0xc1   :  { %89 = vadd.xlane.f32.xlu1 %v88_v26 }
 0x14a   :  { %v90_v27 = vpop.xlane.xlu1 %89 }
 0x14b   :  { %v91_v28 = vrot.slane %v90_v27, 4 }
 0x14d   :  { %v92_v29 = vadd.f32 %v91_v28, %v90_v27 }
 0x14f   :  { %v93_v30 = vrot.slane %v92_v29, 2 }
 0x151   :  { %v94_v31 = vadd.f32 %v93_v30, %v92_v29 }
 0x153   :  { %v95_v32 = vrot.slane %v94_v31, 1 }
 0x155   :  { %v96_v33 = vadd.f32 %v95_v32, %v94_v31 }
 0x157   :  { %107 = vpush %v96_v33 }
 0x188   :  { %s108_s0 = spop %107 }
 0x189   :  { %v98_v34 = vstv %s108_s0 }
 0x18a   :  { %100 = vst [vmem:[%s188_s2] sm:$0xff] %v98_v34 }
 0x18b   :  { %105 = vsyncpa [#allocation3], 1 }
 0x18c   :  { %106 = vsyncpa [#allocation5], 1 }

</bundles_post_ra>
